<compile_context>
chip_gen: v5e
topology: v5e:2x2
jax: 0.10.0
libtpu: 0.0.40
codegen_flags: <defaults>
</compile_context>

<pallas_src>
import jax
import jax.numpy as jnp
from jax.experimental import pallas as pl
from jax.experimental.pallas import tpu as pltpu

LANE = 128
SUBLANE = 8


def _round_up(n, m):
    return ((n + m - 1) // m) * m


# --------------------------------------------------------------------------- #
# One-time parameter preparation (hoisted out of the forward path).
# --------------------------------------------------------------------------- #
def prepare_ehr_params(weights, biases, *, param_dtype=jnp.bfloat16):
    """weights[i]: [out_i, in_i] (PyTorch layout); biases[i]: [out_i].

    Returns matmul-ready params:
      wts[i]: [in_pad_i, out_pad_i] in `param_dtype`  (zero-padded, transposed)
      bss[i]: [1, out_pad_i] in f32                    (zero-padded row vector)
    Intermediate layer widths are padded to a multiple of 128 lanes; the final
    layer keeps its true output width (lane-dense intermediates, byte-minimal
    output write-back).
    """
    num_layers = len(weights)
    wts, bss = [], []
    prev_pad = weights[0].shape[1]  # true input dim for layer 0
    for l in range(num_layers):
        out_d, in_d = weights[l].shape
        w = jnp.asarray(weights[l]).T.astype(jnp.float32)          # [in, out]
        b = jnp.asarray(biases[l]).astype(jnp.float32)[None, :]    # [1, out]
        if prev_pad != in_d:   # extra input rows multiply zero lanes -> zeros
            w = jnp.pad(w, ((0, prev_pad - in_d), (0, 0)))
        out_pad = _round_up(out_d, LANE) if l < num_layers - 1 else out_d
        if out_pad != out_d:
            w = jnp.pad(w, ((0, 0), (0, out_pad - out_d)))
            b = jnp.pad(b, ((0, 0), (0, out_pad - out_d)))
        wts.append(w.astype(param_dtype))
        bss.append(b)          # bias stays f32 (VPU add in f32)
        prev_pad = out_pad
    return wts, bss


# --------------------------------------------------------------------------- #
# Kernel
# --------------------------------------------------------------------------- #
def make_ehr_emb_kernel(num_layers, activation, compute_dtype):
    """Kernel factory: closes over static layer count / activation / matmul dtype."""

    def kernel(*refs):
        x_ref = refs[0]                                    # [B_TILE, D_in]
        w_refs = refs[1:1 + num_layers]                    # [in_pad_l, out_pad_l]
        b_refs = refs[1 + num_layers:1 + 2 * num_layers]   # [1, out_pad_l]
        out_ref = refs[1 + 2 * num_layers]                 # [B_TILE, out_dim]

        h = x_ref[...].astype(jnp.float32)
        for l in range(num_layers):
            # bf16 MXU inputs, f32 accumulation; bias add + activation in f32.
            h = (jnp.dot(h.astype(compute_dtype), w_refs[l][...],
                         preferred_element_type=jnp.float32)
                 + b_refs[l][...])
            if l < num_layers - 1:
                # TODO(synk): nn.Dropout is identity in eval mode; training-mode
                # dropout is not modeled.
                if activation == 'relu':
                    h = jnp.maximum(h, 0.0)
                elif activation == 'leaky_relu':
                    h = jnp.where(h > 0, h, 0.01 * h)
                elif activation == 'tanh':
                    h = jnp.tanh(h)
                else:
                    raise ValueError(f'Unsupported activation: {activation}')
        out_ref[...] = h.astype(out_ref.dtype)

    return kernel


def _resident_param_spec(p):
    """Whole-array, constant-index BlockSpec; single buffer (VMEM-resident)."""
    idx_map = lambda b, nd=p.ndim: (0,) * nd
    try:
        return pl.BlockSpec(p.shape, idx_map, pipeline_mode=pl.Buffered(1))
    except (TypeError, AttributeError):
        return pl.BlockSpec(p.shape, idx_map)


# --------------------------------------------------------------------------- #
# Forward
# --------------------------------------------------------------------------- #
def ehr_emb_forward(x, wts, bss, *, activation='relu', b_tile=512,
                    vmem_budget_bytes=40 * 1024 * 1024):
    """x: [B, input_dim]; (wts, bss) from prepare_ehr_params().
    Returns [B, hidden_dims[-1]] f32."""
    B, d_in = x.shape
    num_layers = len(wts)
    out_dim = wts[-1].shape[1]
    assert wts[0].shape[0] == d_in, (wts[0].shape, d_in)

    x = x.astype(jnp.float32)

    # --- VMEM budget: resident params (single-buffered) + pipelined x/out tiles
    #     + allowance for f32 intermediate activations. Shrink b_tile to fit. ---
    param_bytes = sum(int(p.size) * p.dtype.itemsize for p in (list(wts) + list(bss)))
    max_width = max([d_in, out_dim] + [w.shape[1] for w in wts])

    def footprint(bt):
        return (param_bytes
                + 2 * bt * d_in * 4          # double-buffered input tile
                + 2 * bt * out_dim * 4       # double-buffered output tile
                + 2 * bt * max_width * 4)    # intermediate activations headroom

    b_tile = _round_up(min(b_tile, _round_up(B, SUBLANE)), SUBLANE)
    while b_tile > SUBLANE and footprint(b_tile) > vmem_budget_bytes:
        b_tile = max(SUBLANE, _round_up(b_tile // 2, SUBLANE))

    b_pad = _round_up(B, b_tile)
    x_pad = x
    if b_pad != B:
        # NOTE: for large B choose b_tile dividing B (or handle the tail with a
        # separate small call) to avoid materializing a padded copy of x.
        x_pad = jnp.pad(x_pad, ((0, b_pad - B), (0, 0)))

    params = list(wts) + list(bss)
    in_specs = [pl.BlockSpec((b_tile, d_in), lambda b: (b, 0))]
    in_specs += [_resident_param_spec(p) for p in params]

    kernel = make_ehr_emb_kernel(num_layers, activation, wts[0].dtype)

    vmem_limit = int(min(max(footprint(b_tile) + (4 << 20), 16 << 20), 48 << 20))

    out = pl.pallas_call(
        kernel,
        out_shape=jax.ShapeDtypeStruct((b_pad, out_dim), jnp.float32),
        grid=(b_pad // b_tile,),
        in_specs=in_specs,
        # Final layer output kept at true width: last block dim == full array dim,
        # so no 8x write inflation and no wrapper column-slice copy.
        out_specs=pl.BlockSpec((b_tile, out_dim), lambda b: (b, 0)),
        compiler_params=pltpu.CompilerParams(
            dimension_semantics=("parallel",),   # megacore: split batch tiles (v7x)
            vmem_limit_bytes=vmem_limit),
    )(x_pad, *params)

    return out[:B]


# --------------------------------------------------------------------------- #
# Reference + test
# --------------------------------------------------------------------------- #
def reference_forward(x, weights, biases, activation='relu'):
    """Pure-JAX f32 replica of the PyTorch forward (eval mode)."""
    h = x
    for i, (w, b) in enumerate(zip(weights, biases)):
        h = h @ w.T + b
        if i < len(weights) - 1:
            if activation == 'relu':
                h = jax.nn.relu(h)
            elif activation == 'leaky_relu':
                h = jnp.where(h > 0, h, 0.01 * h)
            elif activation == 'tanh':
                h = jnp.tanh(h)
    return h


def init_params(key, input_dim, hidden_dims):
    ks = jax.random.split(key, 2 * len(hidden_dims))
    weights, biases = [], []
    prev = input_dim
    for i, d in enumerate(hidden_dims):
        weights.append(0.1 * jax.random.normal(ks[2 * i], (d, prev), jnp.float32))
        biases.append(0.1 * jax.random.normal(ks[2 * i + 1], (d,), jnp.float32))
        prev = d
    return weights, biases


if __name__ == "__main__":
    # EHREmb(input_dim=32, hidden_dims=[64, 64, 16], activation='relu', dropout=0.2)
    input_dim = 32
    hidden_dims = [64, 64, 16]
    B = 20  # not a multiple of 8 -> exercises the batch-tail padding path

    key = jax.random.PRNGKey(0)
    kx, kp = jax.random.split(key)
    x = jax.random.normal(kx, (B, input_dim), dtype=jnp.float32)
    weights, biases = init_params(kp, input_dim, hidden_dims)

    # One-time parameter preparation (transpose / lane-pad / bf16 cast).
    wts, bss = prepare_ehr_params(weights, biases, param_dtype=jnp.bfloat16)

    out = ehr_emb_forward(x, wts, bss, activation='relu', b_tile=512)
    out = jax.block_until_ready(out)

    ref = reference_forward(x, weights, biases, activation='relu')
    assert out.shape == (B, hidden_dims[-1]), out.shape
    # bf16 matmul inputs (f32 accumulation) -> loosened tolerance vs f32 reference.
    assert jnp.allclose(out, ref, atol=5e-2, rtol=5e-2), (out, ref)
    print("KERNEL_OK")
</pallas_src>

<mosaic_0001>
module attributes {stable_mosaic.version = 11 : i64} {
  func.func @kernel(%arg0: i32, %arg1: memref<24x32xf32, #tpu.memory_space<vmem>>, %arg2: memref<32x128xbf16, #tpu.memory_space<vmem>>, %arg3: memref<128x128xbf16, #tpu.memory_space<vmem>>, %arg4: memref<128x16xbf16, #tpu.memory_space<vmem>>, %arg5: memref<1x128xf32, #tpu.memory_space<vmem>>, %arg6: memref<1x128xf32, #tpu.memory_space<vmem>>, %arg7: memref<1x16xf32, #tpu.memory_space<vmem>>, %arg8: memref<24x16xf32, #tpu.memory_space<vmem>>) attributes {dimension_semantics = [#tpu.dimension_semantics<parallel>], iteration_bounds = array<i64: 1>, scalar_prefetch = 0 : i64, scratch_operands = 0 : i64, tpu.core_type = #tpu.core_type<tc>, window_params = [{transform_indices = @transform_0, window_bounds = array<i64: 24, 32>}, {pipeline_mode = #tpu.pipeline_mode<synchronous>, transform_indices = @transform_1, window_bounds = array<i64: 32, 128>}, {pipeline_mode = #tpu.pipeline_mode<synchronous>, transform_indices = @transform_2, window_bounds = array<i64: 128, 128>}, {pipeline_mode = #tpu.pipeline_mode<synchronous>, transform_indices = @transform_3, window_bounds = array<i64: 128, 16>}, {pipeline_mode = #tpu.pipeline_mode<synchronous>, transform_indices = @transform_4, window_bounds = array<i64: 1, 128>}, {pipeline_mode = #tpu.pipeline_mode<synchronous>, transform_indices = @transform_5, window_bounds = array<i64: 1, 128>}, {pipeline_mode = #tpu.pipeline_mode<synchronous>, transform_indices = @transform_6, window_bounds = array<i64: 1, 16>}, {transform_indices = @transform_7, window_bounds = array<i64: 24, 16>}]} {
    %c0 = arith.constant 0 : index
    %c0_0 = arith.constant 0 : index
    %0 = vector.load %arg1[%c0, %c0_0] : memref<24x32xf32, #tpu.memory_space<vmem>>, vector<24x32xf32>
    %1 = arith.truncf %0 : vector<24x32xf32> to vector<24x32xbf16>
    %c0_1 = arith.constant 0 : index
    %c0_2 = arith.constant 0 : index
    %2 = vector.load %arg2[%c0_1, %c0_2] : memref<32x128xbf16, #tpu.memory_space<vmem>>, vector<32x128xbf16>
    %cst = arith.constant dense<0.000000e+00> : vector<24x128xf32>
    %3 = tpu.matmul %1, %2, %cst {dimension_numbers = #tpu.dot_dimension_numbers<[1], [0], [0], [1], [0, 0, 1, 1], [], []>} : vector<24x32xbf16>, vector<32x128xbf16>, vector<24x128xf32> -> vector<24x128xf32>
    %c0_3 = arith.constant 0 : index
    %c0_4 = arith.constant 0 : index
    %4 = vector.load %arg5[%c0_3, %c0_4] : memref<1x128xf32, #tpu.memory_space<vmem>>, vector<1x128xf32>
    %5 = vector.broadcast %4 : vector<1x128xf32> to vector<24x128xf32>
    %6 = arith.addf %3, %5 : vector<24x128xf32>
    %cst_5 = arith.constant 0.000000e+00 : f32
    %7 = vector.broadcast %cst_5 : f32 to vector<24x128xf32>
    %8 = arith.maximumf %6, %7 : vector<24x128xf32>
    %9 = arith.truncf %8 : vector<24x128xf32> to vector<24x128xbf16>
    %c0_6 = arith.constant 0 : index
    %c0_7 = arith.constant 0 : index
    %10 = vector.load %arg3[%c0_6, %c0_7] : memref<128x128xbf16, #tpu.memory_space<vmem>>, vector<128x128xbf16>
    %cst_8 = arith.constant dense<0.000000e+00> : vector<24x128xf32>
    %11 = tpu.matmul %9, %10, %cst_8 {dimension_numbers = #tpu.dot_dimension_numbers<[1], [0], [0], [1], [0, 0, 1, 1], [], []>} : vector<24x128xbf16>, vector<128x128xbf16>, vector<24x128xf32> -> vector<24x128xf32>
    %c0_9 = arith.constant 0 : index
    %c0_10 = arith.constant 0 : index
    %12 = vector.load %arg6[%c0_9, %c0_10] : memref<1x128xf32, #tpu.memory_space<vmem>>, vector<1x128xf32>
    %13 = vector.broadcast %12 : vector<1x128xf32> to vector<24x128xf32>
    %14 = arith.addf %11, %13 : vector<24x128xf32>
    %cst_11 = arith.constant 0.000000e+00 : f32
    %15 = vector.broadcast %cst_11 : f32 to vector<24x128xf32>
    %16 = arith.maximumf %14, %15 : vector<24x128xf32>
    %17 = arith.truncf %16 : vector<24x128xf32> to vector<24x128xbf16>
    %c0_12 = arith.constant 0 : index
    %c0_13 = arith.constant 0 : index
    %18 = vector.load %arg4[%c0_12, %c0_13] : memref<128x16xbf16, #tpu.memory_space<vmem>>, vector<128x16xbf16>
    %cst_14 = arith.constant dense<0.000000e+00> : vector<24x16xf32>
    %19 = tpu.matmul %17, %18, %cst_14 {dimension_numbers = #tpu.dot_dimension_numbers<[1], [0], [0], [1], [0, 0, 1, 1], [], []>} : vector<24x128xbf16>, vector<128x16xbf16>, vector<24x16xf32> -> vector<24x16xf32>
    %c0_15 = arith.constant 0 : index
    %c0_16 = arith.constant 0 : index
    %20 = vector.load %arg7[%c0_15, %c0_16] : memref<1x16xf32, #tpu.memory_space<vmem>>, vector<1x16xf32>
    %21 = vector.broadcast %20 : vector<1x16xf32> to vector<24x16xf32>
    %22 = arith.addf %19, %21 : vector<24x16xf32>
    %c0_17 = arith.constant 0 : index
    %c0_18 = arith.constant 0 : index
    %23 = vector.load %arg8[%c0_17, %c0_18] : memref<24x16xf32, #tpu.memory_space<vmem>>, vector<24x16xf32>
    tpu.vector_store %arg8[%c0_17, %c0_18], %22 {strides = array<i32>} : memref<24x16xf32, #tpu.memory_space<vmem>>, vector<24x16xf32>,
    return
  }
  func.func @transform_0(%arg0: i32) -> (i32, i32) {
    %c0_i32 = arith.constant 0 : i32
    %c0_i32_0 = arith.constant 0 : i32
    return %arg0, %c0_i32 : i32, i32
  }
  func.func @transform_1(%arg0: i32) -> (i32, i32) {
    %c0_i32 = arith.constant 0 : i32
    %c0_i32_0 = arith.constant 0 : i32
    %c0_i32_1 = arith.constant 0 : i32
    return %c0_i32, %c0_i32_0 : i32, i32
  }
  func.func @transform_2(%arg0: i32) -> (i32, i32) {
    %c0_i32 = arith.constant 0 : i32
    %c0_i32_0 = arith.constant 0 : i32
    %c0_i32_1 = arith.constant 0 : i32
    return %c0_i32, %c0_i32_0 : i32, i32
  }
  func.func @transform_3(%arg0: i32) -> (i32, i32) {
    %c0_i32 = arith.constant 0 : i32
    %c0_i32_0 = arith.constant 0 : i32
    %c0_i32_1 = arith.constant 0 : i32
    return %c0_i32, %c0_i32_0 : i32, i32
  }
  func.func @transform_4(%arg0: i32) -> (i32, i32) {
    %c0_i32 = arith.constant 0 : i32
    %c0_i32_0 = arith.constant 0 : i32
    %c0_i32_1 = arith.constant 0 : i32
    return %c0_i32, %c0_i32_0 : i32, i32
  }
  func.func @transform_5(%arg0: i32) -> (i32, i32) {
    %c0_i32 = arith.constant 0 : i32
    %c0_i32_0 = arith.constant 0 : i32
    %c0_i32_1 = arith.constant 0 : i32
    return %c0_i32, %c0_i32_0 : i32, i32
  }
  func.func @transform_6(%arg0: i32) -> (i32, i32) {
    %c0_i32 = arith.constant 0 : i32
    %c0_i32_0 = arith.constant 0 : i32
    %c0_i32_1 = arith.constant 0 : i32
    return %c0_i32, %c0_i32_0 : i32, i32
  }
  func.func @transform_7(%arg0: i32) -> (i32, i32) {
    %c0_i32 = arith.constant 0 : i32
    %c0_i32_0 = arith.constant 0 : i32
    return %arg0, %c0_i32 : i32, i32
  }
}

</mosaic_0001>

<bundles_post_ra>
// kernel: tpu_custom_call.1
= control target key start
LH: loop header
LB: loop body
LE: loop exit
PB: predicated region body
PF: predicated region fallthrough
CT: control target
= control target key end

     0   :  { %12 = vsyncpa [#allocation3], 0  ;;  %s588_s0 = inlined_call_operand.hbm [shape: f32[24,32], index: 0, kind: input, shape index: {}]   ;;  %s589_s1 = inlined_call_operand.hbm [shape: bf16[32,128], index: 1, kind: input, shape index: {}]   ;;  %s590_s2 = inlined_call_operand.vmem [shape: bf16[128,128], index: 2, kind: input, shape index: {}]   ;;  %s591_s3 = inlined_call_operand.vmem [shape: bf16[128,16], index: 3, kind: input, shape index: {}]   ;;  %s592_s4 = inlined_call_operand.vmem [shape: f32[1,128], index: 4, kind: input, shape index: {}]   ;;  %s593_s5 = inlined_call_operand.vmem [shape: f32[1,128], index: 5, kind: input, shape index: {}]   ;;  %s594_s6 = inlined_call_operand.vmem [shape: f32[1,16], index: 6, kind: input, shape index: {}]   ;;  %s595_s7 = inlined_call_operand.vmem [shape: f32[24,16], index: 7, kind: output, shape index: {}]  }
   0x1   :  { %s18_s26 = sshll.u32 %s588_s0, 4  ;;  %s19_s26 = int_to_ptr.hbm [resolvable:$true] %s18_s26 }
   0x2   :  { %13 = vsyncpa [#allocation5], 0  ;;  %s470_s27 = smov [#allocation2]   ;;  %s31_s8 = sshll.u32 %s589_s1, 4  ;;  %s32_s8 = int_to_ptr.hbm [resolvable:$true] %s31_s8 }
   0x3   :  { %s20_s28 = sshll.u32 %s470_s27, 4  ;;  %s471_s9 = smov 128   ;;  %s21_s28 = int_to_ptr.vmem [resolvable:$true] %s20_s28 }
   0x4   :  { %s472_s10 = smov 8   ;;  %s473_s11 = smov [#allocation4]  }
   0x5   :  { %26 = dma.hbm_to_vmem [thread:$0]  %s19_s26, 384, %s21_s28, [#allocation3], %s471_s9, %s471_s9, %s472_s10  }
   0x6   :  { %s33_s12 = sshll.u32 %s473_s11, 4  ;;  %s474_s13 = smov 64   ;;  %s34_s12 = int_to_ptr.vmem [resolvable:$true] %s33_s12 }
   0x7   :  { %s475_s14 = smov 4  }
   0x8   :  { %39 = dma.hbm_to_vmem [thread:$0]  %s32_s8, 256, %s34_s12, [#allocation5], %s474_s13, %s474_s13, %s475_s14  }
   0x9   :  { %466 = dma.done.wait [#allocation3], 384  }
   0xa   :  { %467 = vsyncadd [#allocation3], 4294966912 }
   0xb   :  { %468 = dma.done.wait [#allocation5], 256  }
   0xc   :  { %469 = vsyncadd [#allocation5], 4294967040  ;;  %v376_v0 = vld [vmem:[#allocation4 + $0x8] sm:$0xff]  ;;  %v384_v1 = vld [vmem:[%s590_s2 + $0x38] sm:$0xff]  ;;  %vm84_vm0 = vcmask 261120   ;;  %vm291_vm1 = vcmask 130048  }
   0xd   :  { %97 = vmatpush.bf16.msra.mxu0 %v376_v0  ;;  %v375_v2 = vld [vmem:[#allocation4] sm:$0xff]  ;;  %v59_v3 = vld [vmem:[#allocation2] sm:$0xff]  ;;  %v60_v4 = vld [vmem:[#allocation2 + $0x8] sm:$0xff]  ;;  %182 = vmatpush.bf16.msra.mxu1 %v384_v1 }
   0xe   :  { %v383_v5 = vld [vmem:[%s590_s2 + $0x30] sm:$0xff]  ;;  %393 = vmatpush.bf16.msra.mxu3 %v384_v1  ;;  %v62_v6 = vpack.c.bf16 %v60_v4, %v59_v3  ;;  %v382_v7 = vld [vmem:[%s590_s2 + $0x28] sm:$0xff]  ;;  %v381_v8 = vld [vmem:[%s590_s2 + $0x20] sm:$0xff] }
   0xf   :  { %v61_v9 = vld [vmem:[#allocation2 + $0x10] sm:$0xff]  ;;  %v380_v11 = vld [vmem:[%s590_s2 + $0x18] sm:$0xff]  ;;  %v378_v13 = vld [vmem:[%s590_s2 + $0x8] sm:$0xff] }
  0x10   :  { %v63_v10 = vpack.c.bf16 %v61_v9, %v61_v9  ;;  %v379_v12 = vld [vmem:[%s590_s2 + $0x10] sm:$0xff]  ;;  %v377_v14 = vld [vmem:[%s590_s2] sm:$0xff]  ;;  %v392_v15 = vld [vmem:[%s591_s3 + $0x38] sm:$0xff] }
  0x11   :  { %98 = vmatpush.bf16.msra.mxu0 %v375_v2  ;;  %183 = vmatpush.bf16.msra.mxu1 %v383_v5  ;;  %v391_v16 = vld [vmem:[%s591_s3 + $0x30] sm:$0xff]  ;;  %v390_v17 = vld [vmem:[%s591_s3 + $0x28] sm:$0xff]  ;;  %v389_v19 = vld [vmem:[%s591_s3 + $0x20] sm:$0xff] }
  0x12   :  { %394 = vmatpush.bf16.msra.mxu3 %v383_v5  ;;  %401 = vmatpush.bf16.msra.mxu2 %v392_v15  ;;  %v415_v20 = vld [vmem:[%s592_s4] ss:$0 sm:$0xff]  ;;  %v388_v32 = vld [vmem:[%s591_s3 + $0x18] sm:$0xff]  ;;  %v387_v33 = vld [vmem:[%s591_s3 + $0x10] sm:$0xff] }
  0x13   :  { %v386_v34 = vld [vmem:[%s591_s3 + $0x8] sm:$0xff]  ;;  %v385_v35 = vld [vmem:[%s591_s3] sm:$0xff] }
  0x14   :  { %309 = vmatmul.msk.bf16.vlgmr.msra.gmra.mxu0 %vm84_vm0, %v62_v6  ;;  %v416_v37 = vld [vmem:[%s593_s5] ss:$0 sm:$0xff] }
  0x15   :  { %184 = vmatpush.bf16.msra.mxu1 %v382_v7  ;;  %273 = vmatpush.bf16.msrb.mxu0 %v392_v15  ;;  %v417_v49 = vld [vmem:[%s594_s6] ss:$0 sm:$0xff] }
  0x16   :  { %395 = vmatpush.bf16.msra.mxu3 %v382_v7  ;;  %402 = vmatpush.bf16.msra.mxu2 %v391_v16 }
  0x19   :  { %185 = vmatpush.bf16.msra.mxu1 %v381_v8  ;;  %274 = vmatpush.bf16.msrb.mxu0 %v391_v16 }
  0x1a   :  { %396 = vmatpush.bf16.msra.mxu3 %v381_v8  ;;  %403 = vmatpush.bf16.msra.mxu2 %v390_v17 }
  0x1d   :  { %186 = vmatpush.bf16.msra.mxu1 %v380_v11  ;;  %275 = vmatpush.bf16.msrb.mxu0 %v390_v17 }
  0x1e   :  { %397 = vmatpush.bf16.msra.mxu3 %v380_v11  ;;  %404 = vmatpush.bf16.msra.mxu2 %v389_v19 }
  0x21   :  { %187 = vmatpush.bf16.msra.mxu1 %v379_v12  ;;  %276 = vmatpush.bf16.msrb.mxu0 %v389_v19 }
  0x22   :  { %398 = vmatpush.bf16.msra.mxu3 %v379_v12  ;;  %405 = vmatpush.bf16.msra.mxu2 %v388_v32 }
  0x24   :  { %310 = vmatmul.msk.bf16.gmra.mxu0 %vm84_vm0, %v63_v10 }
  0x25   :  { %188 = vmatpush.bf16.msra.mxu1 %v378_v13  ;;  %277 = vmatpush.bf16.msrb.mxu0 %v388_v32 }
  0x26   :  { %399 = vmatpush.bf16.msra.mxu3 %v378_v13  ;;  %406 = vmatpush.bf16.msra.mxu2 %v387_v33 }
  0x29   :  { %189 = vmatpush.bf16.msra.mxu1 %v377_v14  ;;  %278 = vmatpush.bf16.msrb.mxu0 %v387_v33 }
  0x2a   :  { %400 = vmatpush.bf16.msra.mxu3 %v377_v14  ;;  %407 = vmatpush.bf16.msra.mxu2 %v386_v34 }
  0x2d   :  { %279 = vmatpush.bf16.msrb.mxu0 %v386_v34 }
  0x2e   :  { %408 = vmatpush.bf16.msra.mxu2 %v385_v35 }
  0x31   :  { %280 = vmatpush.bf16.msrb.mxu0 %v385_v35 }
  0x91   :  { %v100_v18 = vpop.f32.mrf.mxu0 }
  0x92   :  { %v101_v21 = vadd.f32 %v415_v20, %v100_v18 }
  0x94   :  { %v109_v24 = vmax.f32 %v101_v21, 0.0 }
  0x99   :  { %v102_v22 = vpop.f32.mrf.mxu0 }
  0x9a   :  { %v103_v23 = vadd.f32 %v415_v20, %v102_v22 }
  0x9c   :  { %v110_v25 = vmax.f32 %v103_v23, 0.0 }
  0x9e   :  { %v112_v26 = vpack.c.bf16 %v110_v25, %v109_v24 }
  0xa0   :  { %190 = vmatmul.bf16.vlgmr.msra.gmra.mxu1 %v112_v26 }
  0xa1   :  { %v105_v27 = vpop.f32.mrf.mxu0 }
  0xa2   :  { %v106_v28 = vadd.f32 %v415_v20, %v105_v27 }
  0xa4   :  { %v111_v29 = vmax.f32 %v106_v28, 0.0 }
  0xa6   :  { %v113_v30 = vpack.c.bf16 %v111_v29, %v111_v29 }
  0xa8   :  { %195 = vmatmul.bf16.vlgmr.msra.gmra.mxu3 %v113_v30 }
  0xa9   :  { %v107_v31 = vpop.f32.mrf.mxu0 }
 0x11d   :  { %v191_v36 = vpop.f32.mrf.mxu1 }
 0x11e   :  { %v192_v38 = vadd.f32 %v416_v37, %v191_v36 }
 0x120   :  { %v200_v41 = vmax.f32 %v192_v38, 0.0 }
 0x125   :  { %v193_v39 = vpop.f32.mrf.mxu1 }
 0x126   :  { %v194_v40 = vadd.f32 %v416_v37, %v193_v39 }
 0x128   :  { %v201_v42 = vmax.f32 %v194_v40, 0.0 }
 0x12a   :  { %v203_v43 = vpack.c.bf16 %v201_v42, %v200_v41 }
 0x12b   :  { %v196_v44 = vpop.f32.mrf.mxu3 }
 0x12c   :  { %v197_v45 = vadd.f32 %v416_v37, %v196_v44  ;;  %281 = vmatmul.bf16.vlgmr.msrb.gmra.mxu0 %v203_v43 }
 0x12e   :  { %v202_v46 = vmax.f32 %v197_v45, 0.0 }
 0x130   :  { %v204_v47 = vpack.c.bf16 %v202_v46, %v202_v46 }
 0x132   :  { %286 = vmatmul.bf16.vlgmr.msra.gmra.mxu2 %v204_v47 }
 0x133   :  { %v198_v48 = vpop.f32.mrf.mxu3 }
 0x1a9   :  { %v282_v50 = vpop.f32.mrf.mxu0 }
 0x1aa   :  { %v283_v51 = vadd.f32 %v417_v49, %v282_v50 }
 0x1ac   :  { %292 = vst.msk [vmem:[%s595_s7] sm:$0xff] %vm291_vm1, %v283_v51 }
 0x1b1   :  { %v284_v52 = vpop.f32.mrf.mxu0 }
 0x1b2   :  { %v285_v53 = vadd.f32 %v417_v49, %v284_v52 }
 0x1b4   :  { %293 = vst.msk [vmem:[%s595_s7 + $0x8] sm:$0xff] %vm291_vm1, %v285_v53 }
 0x1b5   :  { %v287_v54 = vpop.f32.mrf.mxu2 }
 0x1b6   :  { %v288_v55 = vadd.f32 %v417_v49, %v287_v54 }
 0x1b8   :  { %294 = vst.msk [vmem:[%s595_s7 + $0x10] sm:$0xff] %vm291_vm1, %v288_v55 }
 0x1bd   :  { %v289_v56 = vpop.f32.mrf.mxu2 }
 0x1be   :  { %299 = vsyncpa [#allocation3], 1 }
 0x1bf   :  { %300 = vsyncpa [#allocation5], 1 }

</bundles_post_ra>
